<compile_context>
chip_gen: v7x
topology: tpu7x:2x2x1
jax: 0.10.0
libtpu: 0.0.40
codegen_flags: <defaults>
</compile_context>

<pallas_src>
import functools

import jax
import jax.numpy as jnp
from jax.experimental import pallas as pl
from jax.experimental.pallas import tpu as pltpu


# ---------------------------------------------------------------------------
# Stage 1: per-head Q/K/V projection
# ---------------------------------------------------------------------------
def _qkv_proj_kernel(x_ref, w_ref, q_ref, k_ref, v_ref, *, d):
    """One grid step: (tp, C) @ (C, 3D) for head h; split into q/k/v outputs."""
    h = pl.program_id(2)
    r = jnp.dot(x_ref[...], w_ref[h], preferred_element_type=jnp.float32)  # (tp, 3D)
    q_ref[...] = r[:, :d].astype(q_ref.dtype)
    k_ref[...] = r[:, d:2 * d].astype(k_ref.dtype)
    v_ref[...] = r[:, 2 * d:].astype(v_ref.dtype)


# ---------------------------------------------------------------------------
# Stage 2: flash attention over pre-projected per-head Q/K/V + fused out-proj
# ---------------------------------------------------------------------------
def _flash_mha_kernel(q_ref, k_ref, v_ref, wp_ref, b_ref, o_ref,
                      m_scr, l_scr, acc_scr, *, tq, tkv, n_head):
    qi = pl.program_id(1)
    kv = pl.program_id(2)
    nkv = pl.num_programs(2)

    q_start = qi * tq
    kv_start = kv * tkv

    # New query tile: reset online-softmax state for all heads.
    @pl.when(kv == 0)
    def _init():
        m_scr[...] = jnp.full(m_scr.shape, -1e30, m_scr.dtype)
        l_scr[...] = jnp.zeros(l_scr.shape, l_scr.dtype)
        acc_scr[...] = jnp.zeros(acc_scr.shape, acc_scr.dtype)

    def _process(masked):
        for h in range(n_head):
            qh = q_ref[h]                                   # (tq, D)
            kh = k_ref[h]                                    # (tkv, D)
            vh = v_ref[h]                                    # (tkv, D)
            # s = q @ k^T without an explicit transpose (contract the D axes).
            s = jax.lax.dot_general(qh, kh, (((1,), (1,)), ((), ())),
                                    preferred_element_type=jnp.float32)  # (tq, tkv)
            if masked:  # only blocks that straddle the causal diagonal
                row = jax.lax.broadcasted_iota(jnp.int32, (tq, tkv), 0) + q_start
                col = jax.lax.broadcasted_iota(jnp.int32, (tq, tkv), 1) + kv_start
                s = jnp.where(row >= col, s, -1e30)
            m_prev = m_scr[h]
            m_new = jnp.maximum(m_prev, jnp.max(s, axis=-1, keepdims=True))
            alpha = jnp.exp(m_prev - m_new)
            p = jnp.exp(s - m_new)
            l_scr[h] = alpha * l_scr[h] + jnp.sum(p, axis=-1, keepdims=True)
            acc_scr[h] = alpha * acc_scr[h] + jnp.dot(
                p.astype(vh.dtype), vh, preferred_element_type=jnp.float32)
            m_scr[h] = m_new

    # Causal block classification (scalars).
    block_needed = kv_start < q_start + tq                 # at least one unmasked col
    block_unmasked = kv_start + tkv - 1 <= q_start         # entirely below the diagonal

    @pl.when(jnp.logical_and(block_needed, block_unmasked))
    def _interior():
        _process(masked=False)

    @pl.when(jnp.logical_and(block_needed, jnp.logical_not(block_unmasked)))
    def _diagonal():
        _process(masked=True)

    # Last KV step: normalize, concat heads along lanes, fused output projection.
    @pl.when(kv == nkv - 1)
    def _finalize():
        attn = jnp.concatenate(
            [(acc_scr[h] / l_scr[h]).astype(wp_ref.dtype) for h in range(n_head)],
            axis=-1)                                        # (tq, C)
        out = jnp.dot(attn, wp_ref[...], preferred_element_type=jnp.float32)
        o_ref[...] = (out + b_ref[...].astype(jnp.float32)).astype(o_ref.dtype)


# ---------------------------------------------------------------------------
# Wrapper
# ---------------------------------------------------------------------------
def batch_multi_head_attention(x, wk, wq, wv, wp, bp, *, n_head,
                               q_tile=256, kv_tile=256, proj_tile=256,
                               compute_dtype=None):
    B, T, C = x.shape
    assert C % n_head == 0
    D = C // n_head

    if compute_dtype is not None:  # e.g. jnp.bfloat16 for the MXU fast path
        x = x.astype(compute_dtype)
        wk, wq, wv, wp, bp = (w.astype(compute_dtype) for w in (wk, wq, wv, wp, bp))
    dt = x.dtype
    itemsize = jnp.dtype(dt).itemsize

    tq = min(q_tile, T)
    tkv = min(kv_tile, T)
    tp = min(proj_tile, T)
    assert T % tq == 0 and T % tkv == 0 and T % tp == 0, \
        "T must be divisible by the tile sizes"

    scale = float(D) ** -0.5

    # nn.Linear convention: W is (out, in), y = x @ W.T. Per-head (C, D) layouts built
    # once on the host so the kernels never transpose weights.
    def per_head(w):                      # (C_out, C_in) -> (H, C_in, D)
        return w.reshape(n_head, D, C).transpose(0, 2, 1)

    w_qkv = jnp.concatenate(
        [per_head(wq) * scale, per_head(wk), per_head(wv)], axis=-1).astype(dt)  # (H, C, 3D)
    wp_t = wp.T.astype(dt)                # (C_in, C_out): out = attn_concat @ wp.T
    bp2 = bp.reshape(1, C).astype(dt)

    # ---------------- Stage 1: Q/K/V projection -> (B, H, T, D) x3 ----------------
    qkv_shape = jax.ShapeDtypeStruct((B, n_head, T, D), dt)
    qkv_spec = pl.BlockSpec((None, None, tp, D), lambda b, t, h: (b, h, t, 0))
    q_all, k_all, v_all = pl.pallas_call(
        functools.partial(_qkv_proj_kernel, d=D),
        out_shape=(qkv_shape, qkv_shape, qkv_shape),
        grid=(B, T // tp, n_head),
        in_specs=[
            pl.BlockSpec((None, tp, C), lambda b, t, h: (b, t, 0)),          # x rows
            pl.BlockSpec((n_head, C, 3 * D), lambda b, t, h: (0, 0, 0)),     # resident W_qkv
        ],
        out_specs=(qkv_spec, qkv_spec, qkv_spec),
        compiler_params=pltpu.CompilerParams(
            dimension_semantics=("parallel", "parallel", "arbitrary")),
        cost_estimate=pl.CostEstimate(
            flops=int(6 * B * T * C * C),
            transcendentals=0,
            bytes_accessed=int((4 * B * T * C + 3 * C * C) * itemsize)),
    )(x, w_qkv)

    # ---------------- Stage 2: flash attention + fused output projection ----------------
    def kv_index(b, qi, kv):
        # Clamp to the last causally-needed KV block: skipped blocks re-use the
        # previous block index, so no DMA is issued for them.
        last_needed = (qi * tq + tq - 1) // tkv
        return (b, 0, jnp.minimum(kv, last_needed), 0)

    out = pl.pallas_call(
        functools.partial(_flash_mha_kernel, tq=tq, tkv=tkv, n_head=n_head),
        out_shape=jax.ShapeDtypeStruct((B, T, C), dt),
        grid=(B, T // tq, T // tkv),
        in_specs=[
            pl.BlockSpec((None, n_head, tq, D), lambda b, qi, kv: (b, 0, qi, 0)),  # q (all heads)
            pl.BlockSpec((None, n_head, tkv, D), kv_index),                        # k stream
            pl.BlockSpec((None, n_head, tkv, D), kv_index),                        # v stream
            pl.BlockSpec((C, C), lambda b, qi, kv: (0, 0)),                        # resident Wp^T
            pl.BlockSpec((1, C), lambda b, qi, kv: (0, 0)),                        # resident bias
        ],
        out_specs=pl.BlockSpec((None, tq, C), lambda b, qi, kv: (b, qi, 0)),
        scratch_shapes=[
            pltpu.VMEM((n_head, tq, 1), jnp.float32),   # running max
            pltpu.VMEM((n_head, tq, 1), jnp.float32),   # running sum
            pltpu.VMEM((n_head, tq, D), jnp.float32),   # weighted-V accumulator
        ],
        compiler_params=pltpu.CompilerParams(
            dimension_semantics=("parallel", "parallel", "arbitrary"),
            vmem_limit_bytes=32 * 1024 * 1024),
        cost_estimate=pl.CostEstimate(
            flops=int(B * (4 * T * T * C + 2 * T * C * C)),
            transcendentals=int(B * n_head * T * T),
            bytes_accessed=int((4 * B * T * C + C * C + C) * itemsize)),
    )(q_all, k_all, v_all, wp_t, bp2)
    return out


# ---------------------------------------------------------------------------
# Pure-JAX reference (mirrors the PyTorch module in eval mode)
# ---------------------------------------------------------------------------
def reference(x, wk, wq, wv, wp, bp, *, n_head):
    B, T, C = x.shape
    D = C // n_head
    k = (x @ wk.T).reshape(B, T, n_head, D).transpose(0, 2, 1, 3)
    q = (x @ wq.T).reshape(B, T, n_head, D).transpose(0, 2, 1, 3)
    v = (x @ wv.T).reshape(B, T, n_head, D).transpose(0, 2, 1, 3)
    wei = (q @ k.transpose(0, 1, 3, 2)) * (D ** -0.5)
    tril = jnp.tril(jnp.ones((T, T)))
    wei = jnp.where(tril == 0, -jnp.inf, wei)
    wei = jax.nn.softmax(wei, axis=-1)
    out = wei @ v
    out = out.transpose(0, 2, 1, 3).reshape(B, T, C)
    return out @ wp.T + bp


if __name__ == "__main__":
    # Small config consistent with the module (n_head=6, n_embed divisible by n_head).
    # Tiles of 16 give a (2, 2, 2) flash grid: exercises the online-softmax carry,
    # the masked/unmasked block split, and the clamped (skipped) KV block path.
    B, T, C, H = 2, 32, 48, 6

    key = jax.random.PRNGKey(0)
    k0, k1, k2, k3, k4, k5 = jax.random.split(key, 6)

    x = jax.random.normal(k0, (B, T, C), dtype=jnp.float32)
    wscale = 1.0 / (C ** 0.5)
    wk = jax.random.normal(k1, (C, C), dtype=jnp.float32) * wscale
    wq = jax.random.normal(k2, (C, C), dtype=jnp.float32) * wscale
    wv = jax.random.normal(k3, (C, C), dtype=jnp.float32) * wscale
    wp = jax.random.normal(k4, (C, C), dtype=jnp.float32) * wscale
    bp = jax.random.normal(k5, (C,), dtype=jnp.float32) * wscale

    out = batch_multi_head_attention(x, wk, wq, wv, wp, bp, n_head=H,
                                     q_tile=16, kv_tile=16, proj_tile=16)
    out = jax.block_until_ready(out)

    ref = reference(x, wk, wq, wv, wp, bp, n_head=H)
    assert out.shape == ref.shape
    err = float(jnp.max(jnp.abs(out - ref)))
    assert jnp.allclose(out, ref, rtol=2e-3, atol=2e-3), \
        "mismatch vs JAX reference (max abs err = %e)" % err

    print("KERNEL_OK")
</pallas_src>

<mosaic_0001>
module attributes {stable_mosaic.version = 11 : i64} {
  func.func @_qkv_proj_kernel(%arg0: i32, %arg1: i32, %arg2: i32, %arg3: memref<1x16x48xf32, #tpu.memory_space<vmem>>, %arg4: memref<6x48x24xf32, #tpu.memory_space<vmem>>, %arg5: memref<1x1x16x8xf32, #tpu.memory_space<vmem>>, %arg6: memref<1x1x16x8xf32, #tpu.memory_space<vmem>>, %arg7: memref<1x1x16x8xf32, #tpu.memory_space<vmem>>) attributes {dimension_semantics = [#tpu.dimension_semantics<parallel>, #tpu.dimension_semantics<parallel>, #tpu.dimension_semantics<arbitrary>], iteration_bounds = array<i64: 2, 2, 6>, scalar_prefetch = 0 : i64, scratch_operands = 0 : i64, tpu.core_type = #tpu.core_type<tc>, window_params = [{transform_indices = @transform_0, window_bounds = array<i64: 1, 16, 48>}, {pipeline_mode = #tpu.pipeline_mode<synchronous>, transform_indices = @transform_1, window_bounds = array<i64: 6, 48, 24>}, {transform_indices = @transform_2, window_bounds = array<i64: 1, 1, 16, 8>}, {transform_indices = @transform_3, window_bounds = array<i64: 1, 1, 16, 8>}, {transform_indices = @transform_4, window_bounds = array<i64: 1, 1, 16, 8>}]} {
    %c0 = arith.constant 0 : index
    %c0_0 = arith.constant 0 : index
    %c0_1 = arith.constant 0 : index
    %0 = vector.load %arg3[%c0, %c0_0, %c0_1] : memref<1x16x48xf32, #tpu.memory_space<vmem>>, vector<1x16x48xf32>
    %1 = vector.shape_cast %0 : vector<1x16x48xf32> to vector<16x48xf32>
    %2 = arith.index_cast %arg2 : i32 to index
    %c0_2 = arith.constant 0 : index
    %c0_3 = arith.constant 0 : index
    %3 = vector.load %arg4[%2, %c0_2, %c0_3] : memref<6x48x24xf32, #tpu.memory_space<vmem>>, vector<1x48x24xf32>
    %4 = vector.shape_cast %3 : vector<1x48x24xf32> to vector<48x24xf32>
    %cst = arith.constant dense<0.000000e+00> : vector<16x24xf32>
    %5 = tpu.matmul %1, %4, %cst {dimension_numbers = #tpu.dot_dimension_numbers<[1], [0], [0], [1], [0, 0, 1, 1], [], []>} : vector<16x48xf32>, vector<48x24xf32>, vector<16x24xf32> -> vector<16x24xf32>
    %6 = vector.extract_strided_slice %5 {offsets = [0, 0], sizes = [16, 8], strides = [1, 1]} : vector<16x24xf32> to vector<16x8xf32>
    %c0_4 = arith.constant 0 : index
    %c0_5 = arith.constant 0 : index
    %c0_6 = arith.constant 0 : index
    %c0_7 = arith.constant 0 : index
    %7 = vector.load %arg5[%c0_4, %c0_5, %c0_6, %c0_7] : memref<1x1x16x8xf32, #tpu.memory_space<vmem>>, vector<1x1x16x8xf32>
    %8 = vector.shape_cast %7 : vector<1x1x16x8xf32> to vector<16x8xf32>
    %9 = vector.shape_cast %6 : vector<16x8xf32> to vector<1x1x16x8xf32>
    tpu.vector_store %arg5[%c0_4, %c0_5, %c0_6, %c0_7], %9 {strides = array<i32>} : memref<1x1x16x8xf32, #tpu.memory_space<vmem>>, vector<1x1x16x8xf32>,
    %10 = vector.extract_strided_slice %5 {offsets = [0, 8], sizes = [16, 8], strides = [1, 1]} : vector<16x24xf32> to vector<16x8xf32>
    %c0_8 = arith.constant 0 : index
    %c0_9 = arith.constant 0 : index
    %c0_10 = arith.constant 0 : index
    %c0_11 = arith.constant 0 : index
    %11 = vector.load %arg6[%c0_8, %c0_9, %c0_10, %c0_11] : memref<1x1x16x8xf32, #tpu.memory_space<vmem>>, vector<1x1x16x8xf32>
    %12 = vector.shape_cast %11 : vector<1x1x16x8xf32> to vector<16x8xf32>
    %13 = vector.shape_cast %10 : vector<16x8xf32> to vector<1x1x16x8xf32>
    tpu.vector_store %arg6[%c0_8, %c0_9, %c0_10, %c0_11], %13 {strides = array<i32>} : memref<1x1x16x8xf32, #tpu.memory_space<vmem>>, vector<1x1x16x8xf32>,
    %14 = vector.extract_strided_slice %5 {offsets = [0, 16], sizes = [16, 8], strides = [1, 1]} : vector<16x24xf32> to vector<16x8xf32>
    %c0_12 = arith.constant 0 : index
    %c0_13 = arith.constant 0 : index
    %c0_14 = arith.constant 0 : index
    %c0_15 = arith.constant 0 : index
    %15 = vector.load %arg7[%c0_12, %c0_13, %c0_14, %c0_15] : memref<1x1x16x8xf32, #tpu.memory_space<vmem>>, vector<1x1x16x8xf32>
    %16 = vector.shape_cast %15 : vector<1x1x16x8xf32> to vector<16x8xf32>
    %17 = vector.shape_cast %14 : vector<16x8xf32> to vector<1x1x16x8xf32>
    tpu.vector_store %arg7[%c0_12, %c0_13, %c0_14, %c0_15], %17 {strides = array<i32>} : memref<1x1x16x8xf32, #tpu.memory_space<vmem>>, vector<1x1x16x8xf32>,
    return
  }
  func.func @transform_0(%arg0: i32, %arg1: i32, %arg2: i32) -> (i32, i32, i32) {
    %c0_i32 = arith.constant 0 : i32
    %c0_i32_0 = arith.constant 0 : i32
    return %arg0, %arg1, %c0_i32 : i32, i32, i32
  }
  func.func @transform_1(%arg0: i32, %arg1: i32, %arg2: i32) -> (i32, i32, i32) {
    %c0_i32 = arith.constant 0 : i32
    %c0_i32_0 = arith.constant 0 : i32
    %c0_i32_1 = arith.constant 0 : i32
    %c0_i32_2 = arith.constant 0 : i32
    return %c0_i32, %c0_i32_0, %c0_i32_1 : i32, i32, i32
  }
  func.func @transform_2(%arg0: i32, %arg1: i32, %arg2: i32) -> (i32, i32, i32, i32) {
    %c0_i32 = arith.constant 0 : i32
    %c0_i32_0 = arith.constant 0 : i32
    return %arg0, %arg2, %arg1, %c0_i32 : i32, i32, i32, i32
  }
  func.func @transform_3(%arg0: i32, %arg1: i32, %arg2: i32) -> (i32, i32, i32, i32) {
    %c0_i32 = arith.constant 0 : i32
    %c0_i32_0 = arith.constant 0 : i32
    return %arg0, %arg2, %arg1, %c0_i32 : i32, i32, i32, i32
  }
  func.func @transform_4(%arg0: i32, %arg1: i32, %arg2: i32) -> (i32, i32, i32, i32) {
    %c0_i32 = arith.constant 0 : i32
    %c0_i32_0 = arith.constant 0 : i32
    return %arg0, %arg2, %arg1, %c0_i32 : i32, i32, i32, i32
  }
}

</mosaic_0001>

<bundles_post_ra>
// kernel: tpu_custom_call.1
= control target key start
LH: loop header
LB: loop body
LE: loop exit
PB: predicated region body
PF: predicated region fallthrough
CT: control target
= control target key end

     0   :  { %s878_s15 = smov 0   ;;  %s880_s16 = smov 0   ;;  %s970_s0 = inlined_call_operand.vmem [shape: f32[2,32,48], index: 0, kind: input, shape index: {}]   ;;  %s971_s1 = inlined_call_operand.vmem [shape: f32[6,48,24], index: 1, kind: input, shape index: {}]   ;;  %s972_s2 = inlined_call_operand.vmem [shape: f32[2,6,32,8], index: 2, kind: output, shape index: {0}]   ;;  %s973_s3 = inlined_call_operand.vmem [shape: f32[2,6,32,8], index: 3, kind: output, shape index: {1}]   ;;  %s974_s4 = inlined_call_operand.vmem [shape: f32[2,6,32,8], index: 4, kind: output, shape index: {2}]  }
   0x1   :  { %s882_s17 = smov 0   ;;  %s884_s18 = smov 0  }
   0x2   :  { %s886_s19 = smov 0   ;;  %s888_s20 = smov 0  }
   0x3   :  { %s890_s21 = smov 0  }
   0x4 LB: > { %s27_s22 = sadd.s32 1, %s837_s18  ;;  %s30_s23 = sadd.s32 1, %s841_s19  ;;  %s849_s21 = sphi %s890_s21, %s15_s21   ;;  %s845_s20 = sphi %s888_s20, %s980_s20   ;;  %s841_s19 = sphi %s886_s19, %s979_s19   ;;  %s837_s18 = sphi %s884_s18, %s978_s18   ;;  %s833_s17 = sphi %s882_s17, %s977_s17   ;;  %s829_s16 = sphi %s880_s16, %s976_s16   ;;  %s825_s15 = sphi %s878_s15, %s975_s15  }
   0x5   : > { %p28_p0 = scmp.ge.s32.totalorder %s27_s22, 6  ;;  %p684_p1 = scmp.ge.s32.totalorder %s849_s21, 1 }
   0x6   : > { %p205_p2 = scmp.lt.s32.totalorder %s849_s21, 25  ;;  %s34_s24 = sadd.s32 1, %s845_s20 }
   0x7   : > { %s982_s22 = smov (%p28_p0, %s27_s22), 0  ;;  %s984_s23 = smov (!%p28_p0, %s30_s23), %s841_s19 }
   0x8   : > { %p206_p3 = pnand %p684_p1, %p205_p2  ;;  %p32_p4 = scmp.ge.s32.totalorder %s984_s23, 2 }
   0x9   : > { %s323_s25 = smul.u32 (!%p206_p3), 48, %s825_s15  ;;  %s685_s26 = sshll.u32 (!%p206_p3), %s829_s16, 1  ;;  %vm331_vm0 = vcmask (!%p206_p3), 392192   ;;  %vm413_vm1 = vcmask (!%p206_p3), 64512  }
   0xa   : > { %s986_s23 = smov (%p32_p4, %s984_s23), 0  ;;  %s988_s24 = smov (!%p32_p4, %s34_s24), %s845_s20 }
   0xb   : > { %p36_p5 = scmp.ge.s32.totalorder %s988_s24, 2  ;;  %209 = sbr.rel (%p206_p3) target bundleno = 362 (0x16a), region = 28 }
   0xc   : > { %p270_p6 = scmp.lt.s32.totalorder (!%p206_p3), %s833_s17, 1  ;;  %p272_p7 = scmp.lt.s32.totalorder (!%p206_p3), %s685_s26, 3 }
   0xd   : > { %s990_s24 = smov (%p36_p5, %s988_s24), 0  ;;  %s324_s29 = scalar_lea.vmem (!%p206_p3), %s971_s1, %s323_s25 }
   0xe   : > { %v325_v0 = vld [vmem:[%s324_s29] sm:$0xff] (!%p206_p3)  ;;  %v326_v1 = vld [vmem:[%s324_s29 + $0x8] sm:$0xff] (!%p206_p3)  ;;  %v327_v2 = vld [vmem:[%s324_s29 + $0x10] sm:$0xff] (!%p206_p3)  ;;  %p282_p8 = scmp.lt.s32.totalorder (!%p206_p3), %s825_s15, 5 }
   0xf   : > { %v724_v3 = vpack.c.bf16 (!%p206_p3), %v326_v1, %v325_v0  ;;  %v328_v4 = vld [vmem:[%s324_s29 + $0x18] sm:$0xff] (!%p206_p3)  ;;  %v329_v6 = vld [vmem:[%s324_s29 + $0x20] sm:$0xff] (!%p206_p3)  ;;  %v330_v7 = vld [vmem:[%s324_s29 + $0x28] sm:$0xff] (!%p206_p3) }
  0x10   : > { %v728_v5 = vpack.c.bf16 (!%p206_p3), %v328_v4, %v327_v2  ;;  %v732_v8 = vpack.c.bf16 (!%p206_p3), %v330_v7, %v329_v6 }
  0x11   : > { %725 = vmatprep.subr.bf16.mxu0 (!%p206_p3), %v724_v3 }
  0x12   : > { %s992_s17 = smov (!%p270_p6, %s833_s17), 1  ;;  %s994_s26 = smov (!%p272_p7, %s685_s26), 3  ;;  %727 = vmatpush3.bf16.msra.mxu0 %v724_v3 }
  0x13   : > { %s686_s30 = sshll.u32 %s992_s17, 2  ;;  %729 = vmatprep.subr.bf16.mxu0 %v728_v5  ;;  %s736_s10 = smul.u32 24, %s992_s17 }
  0x14   : > { %s275_s5 = sadd.s32 %s686_s30, %s994_s26  ;;  %s996_s15 = smov (!%p282_p8, %s825_s15), 5 }
  0x15   : > { %s687_s6 = sshll.u32 %s275_s5, 3  ;;  %s689_s11 = sshll.u32 %s996_s15, 2 }
  0x16   : > { %s277_s9 = scalar_lea.vmem %s970_s0, %s687_s6  ;;  %731 = vmatpush3.bf16.msra.mxu0 %v728_v5  ;;  %s287_s12 = sadd.s32 %s689_s11, %s994_s26 }
  0x17   : > { %v321_v9 = vld [vmem:[%s277_s9] sm:$0xff]  ;;  %733 = vmatprep.subr.bf16.mxu0 %v732_v8  ;;  %s289_s13 = sadd.s32 %s736_s10, %s287_s12  ;;  %v322_v10 = vld [vmem:[%s277_s9 + $0x8] sm:$0xff]  ;;  %s851_s17 = smov 112  }
  0x18   : > { %721 = vmatprep.mubr.msk.f32.mxu0 %vm331_vm0, %v321_v9  ;;  %s690_s14 = sshll.u32 %s289_s13, 3  ;;  %s852_s15 = smov 120  }
  0x19   : > { %s291_s27 = scalar_lea.vmem %s972_s2, %s690_s14  ;;  %s319_s29 = scalar_lea.vmem %s974_s4, %s690_s14 }
  0x1a   : > { %735 = vmatpush3.bf16.msra.mxu0 %v732_v8  ;;  %s305_s6 = scalar_lea.vmem %s973_s3, %s690_s14 }
  0x1d   : > { %722 = vmatmul.mubr.msk.f32.vlgmr.msra.gmra.mrb[0].mxu0 %vm331_vm0, %v322_v10 }
  0xf0   : > { %v723_v11 = vpop.f32.mrb[0].mxu0 }
  0xf1   : > { %415 = vst.msk [vmem:[%s291_s27 + $0x8] sm:$0xff] %vm413_vm1, %v723_v11  ;;  %v404_v12 = vpop.f32.mrb[1].mxu0 }
  0xf2   : > { %414 = vst.msk [vmem:[%s291_s27] sm:$0xff] %vm413_vm1, %v404_v12  ;;  %426 = vrot.lane.b32.xlu1 %v404_v12, %s851_s17  ;;  %418 = vrot.lane.b32.xlu0 %v404_v12, %s852_s15 }
  0xf6   : > { %428 = vrot.lane.b32.xlu1 %v723_v11, %s851_s17  ;;  %420 = vrot.lane.b32.xlu0 %v723_v11, %s852_s15 }
 0x164   : > { %v427_v13 = vpop.permute.xlu1 %426  ;;  %v419_v14 = vpop.permute.xlu0 %418 }
 0x165   : > { %432 = vst.msk [vmem:[%s319_s29] sm:$0xff] %vm413_vm1, %v427_v13  ;;  %424 = vst.msk [vmem:[%s305_s6] sm:$0xff] %vm413_vm1, %v419_v14 }
 0x168   : > { %v429_v15 = vpop.permute.xlu1 %428  ;;  %v421_v16 = vpop.permute.xlu0 %420 }
 0x169   : > { %433 = vst.msk [vmem:[%s319_s29 + $0x8] sm:$0xff] %vm413_vm1, %v429_v15  ;;  %425 = vst.msk [vmem:[%s305_s6 + $0x8] sm:$0xff] %vm413_vm1, %v421_v16 }
 0x16a PF: > { %s15_s21 = sadd.s32 1, %s849_s21   ;;  %s975_s15 = smov %s837_s18 }
 0x16b   : > { %p12_p9 = scmp.ge.s32.totalorder %s15_s21, 26   ;;  %s976_s16 = smov %s841_s19 }
 0x16c   : > { %s977_s17 = smov %s845_s20  ;;  %s978_s18 = smov %s982_s22 }
 0x16d   : > { %s979_s19 = smov %s986_s23  ;;  %s980_s20 = smov %s990_s24 }
 0x16e   :  { %14 = sbr.rel (!%p12_p9) target bundleno = 4 (0x4), region = 83 }

</bundles_post_ra>
